<compile_context>
chip_gen: v6e
topology: v6e:2x2x1
jax: 0.10.0
libtpu: 0.0.40
codegen_flags: <defaults>
</compile_context>

<pallas_src>
from functools import partial

import jax
import jax.numpy as jnp
from jax.experimental import pallas as pl
from jax.experimental.pallas import tpu as pltpu

IN_FEATURES = 256
OUT_FEATURES = 10


def _round_up(n, m):
    return ((n + m - 1) // m) * m


def _chead_kernel(x_ref, w_ref, b_ref, o_ref):
    # (TB, 256) @ (256, 10) on the MXU with f32 accumulation, + bias broadcast.
    acc = jnp.dot(x_ref[...], w_ref[...], preferred_element_type=jnp.float32)
    o_ref[...] = (acc + b_ref[...]).astype(o_ref.dtype)


def prepare_params(weight, bias):
    """Once-per-model param prep.

    weight: (10, 256) PyTorch nn.Linear layout -> transposed (256, 10)
    bias:   (10,)                              -> (1, 10)
    """
    return weight.T, bias.reshape(1, OUT_FEATURES)


@partial(jax.jit, static_argnames=("block_b",))
def chead_forward_prepared(x, w_t, b_row, block_b=1024):
    """x: (B, 256); w_t: (256, 10); b_row: (1, 10) -> (B, 10)."""
    B, D = x.shape
    assert D == IN_FEATURES

    # Batch tile: large (default 1024) for pipelining efficiency, but capped so
    # the batch axis splits into >= 2 tiles (megacore-friendly on v7x) and
    # always a multiple of 8 to satisfy the (8, 128) sublane constraint.
    TB = min(block_b, max(8, _round_up(pl.cdiv(B, 2), 8)))
    grid_b = pl.cdiv(B, TB)  # ragged last block handled by Pallas (no jnp.pad)

    x_elt = jnp.dtype(x.dtype).itemsize
    w_elt = jnp.dtype(w_t.dtype).itemsize
    cost = pl.CostEstimate(
        flops=2 * B * D * OUT_FEATURES,
        transcendentals=0,
        bytes_accessed=(
            B * D * x_elt                       # x read
            + B * OUT_FEATURES * x_elt          # output write
            + D * OUT_FEATURES * w_elt          # weight read (once)
            + OUT_FEATURES * w_elt              # bias read (once)
        ),
    )

    out = pl.pallas_call(
        _chead_kernel,
        out_shape=jax.ShapeDtypeStruct((B, OUT_FEATURES), x.dtype),
        grid_spec=pltpu.PrefetchScalarGridSpec(
            num_scalar_prefetch=0,
            grid=(grid_b,),
            in_specs=[
                pl.BlockSpec((TB, D), lambda i: (i, 0)),             # x tile, pipelined
                pl.BlockSpec((D, OUT_FEATURES), lambda i: (0, 0)),   # weight, VMEM-resident
                pl.BlockSpec((1, OUT_FEATURES), lambda i: (0, 0)),   # bias, VMEM-resident
            ],
            out_specs=pl.BlockSpec((TB, OUT_FEATURES), lambda i: (i, 0)),
        ),
        compiler_params=pltpu.CompilerParams(
            dimension_semantics=("parallel",),  # megacore sharding on v7x
        ),
        cost_estimate=cost,
    )(x, w_t, b_row)

    return out


def chead_forward(x, weight, bias, block_b=1024):
    """Convenience wrapper matching the PyTorch CHead forward.

    x: (B, 256); weight: (10, 256); bias: (10,) -> (B, 10).
    For repeated calls, call prepare_params once and use chead_forward_prepared.
    """
    w_t, b_row = prepare_params(weight, bias)
    return chead_forward_prepared(x, w_t, b_row, block_b=block_b)


if __name__ == "__main__":
    key = jax.random.PRNGKey(0)
    kx, kw, kb, kx2 = jax.random.split(key, 4)

    B, D, O = 2, IN_FEATURES, OUT_FEATURES
    x = jax.random.normal(kx, (B, D), dtype=jnp.float32)
    # Deterministic synthetic params (PyTorch nn.Linear(256, 10) shapes).
    weight = jax.random.normal(kw, (O, D), dtype=jnp.float32) * 0.05
    bias = jax.random.normal(kb, (O,), dtype=jnp.float32) * 0.05

    out = chead_forward(x, weight, bias)
    jax.block_until_ready(out)

    ref = x @ weight.T + bias
    assert out.shape == (B, O)
    assert jnp.allclose(out, ref, atol=1e-5, rtol=1e-5)

    # Exercise the multi-tile + ragged-last-block path (B not a multiple of TB).
    B2 = 1000
    x2 = jax.random.normal(kx2, (B2, D), dtype=jnp.float32)
    out2 = chead_forward(x2, weight, bias, block_b=1024)
    jax.block_until_ready(out2)
    ref2 = x2 @ weight.T + bias
    assert out2.shape == (B2, O)
    assert jnp.allclose(out2, ref2, atol=1e-4, rtol=1e-4)

    print("KERNEL_OK")
</pallas_src>

<mosaic_0001>
module attributes {stable_mosaic.version = 11 : i64} {
  func.func @_chead_kernel(%arg0: i32, %arg1: memref<8x256xf32, #tpu.memory_space<vmem>>, %arg2: memref<256x10xf32, #tpu.memory_space<vmem>>, %arg3: memref<1x10xf32, #tpu.memory_space<vmem>>, %arg4: memref<8x10xf32, #tpu.memory_space<vmem>>) attributes {dimension_semantics = [#tpu.dimension_semantics<parallel>], iteration_bounds = array<i64: 1>, scalar_prefetch = 0 : i64, scratch_operands = 0 : i64, tpu.core_type = #tpu.core_type<tc>, window_params = [{transform_indices = @transform_0, window_bounds = array<i64: 8, 256>}, {pipeline_mode = #tpu.pipeline_mode<synchronous>, transform_indices = @transform_1, window_bounds = array<i64: 256, 10>}, {pipeline_mode = #tpu.pipeline_mode<synchronous>, transform_indices = @transform_2, window_bounds = array<i64: 1, 10>}, {transform_indices = @transform_3, window_bounds = array<i64: 8, 10>}]} {
    %c0 = arith.constant 0 : index
    %c0_0 = arith.constant 0 : index
    %0 = vector.load %arg1[%c0, %c0_0] : memref<8x256xf32, #tpu.memory_space<vmem>>, vector<8x256xf32>
    %c0_1 = arith.constant 0 : index
    %c0_2 = arith.constant 0 : index
    %1 = vector.load %arg2[%c0_1, %c0_2] : memref<256x10xf32, #tpu.memory_space<vmem>>, vector<256x10xf32>
    %cst = arith.constant dense<0.000000e+00> : vector<8x10xf32>
    %2 = tpu.matmul %0, %1, %cst {dimension_numbers = #tpu.dot_dimension_numbers<[1], [0], [0], [1], [0, 0, 1, 1], [], []>} : vector<8x256xf32>, vector<256x10xf32>, vector<8x10xf32> -> vector<8x10xf32>
    %c0_3 = arith.constant 0 : index
    %c0_4 = arith.constant 0 : index
    %3 = vector.load %arg3[%c0_3, %c0_4] : memref<1x10xf32, #tpu.memory_space<vmem>>, vector<1x10xf32>
    %4 = vector.broadcast %3 : vector<1x10xf32> to vector<8x10xf32>
    %5 = arith.addf %2, %4 : vector<8x10xf32>
    %c0_5 = arith.constant 0 : index
    %c0_6 = arith.constant 0 : index
    %6 = vector.load %arg4[%c0_5, %c0_6] : memref<8x10xf32, #tpu.memory_space<vmem>>, vector<8x10xf32>
    tpu.vector_store %arg4[%c0_5, %c0_6], %5 {strides = array<i32>} : memref<8x10xf32, #tpu.memory_space<vmem>>, vector<8x10xf32>,
    return
  }
  func.func @transform_0(%arg0: i32) -> (i32, i32) {
    %c0_i32 = arith.constant 0 : i32
    %c0_i32_0 = arith.constant 0 : i32
    return %arg0, %c0_i32 : i32, i32
  }
  func.func @transform_1(%arg0: i32) -> (i32, i32) {
    %c0_i32 = arith.constant 0 : i32
    %c0_i32_0 = arith.constant 0 : i32
    %c0_i32_1 = arith.constant 0 : i32
    return %c0_i32, %c0_i32_0 : i32, i32
  }
  func.func @transform_2(%arg0: i32) -> (i32, i32) {
    %c0_i32 = arith.constant 0 : i32
    %c0_i32_0 = arith.constant 0 : i32
    %c0_i32_1 = arith.constant 0 : i32
    return %c0_i32, %c0_i32_0 : i32, i32
  }
  func.func @transform_3(%arg0: i32) -> (i32, i32) {
    %c0_i32 = arith.constant 0 : i32
    %c0_i32_0 = arith.constant 0 : i32
    return %arg0, %c0_i32 : i32, i32
  }
}

</mosaic_0001>

<bundles_post_ra>
// kernel: chead_forward_prepared.1
= control target key start
LH: loop header
LB: loop body
LE: loop exit
PB: predicated region body
PF: predicated region fallthrough
CT: control target
= control target key end

     0   :  { %8 = vsyncpa [#allocation3], 0  ;;  %vm152_vm0 = vcmask 80896   ;;  %s367_s0 = inlined_call_operand.vmem [shape: f32[2,256], index: 0, kind: input, shape index: {}]   ;;  %s368_s1 = inlined_call_operand.vmem [shape: f32[256,10], index: 1, kind: input, shape index: {}]   ;;  %s369_s2 = inlined_call_operand.vmem [shape: f32[1,10], index: 2, kind: input, shape index: {}]   ;;  %s370_s3 = inlined_call_operand.hbm [shape: f32[2,10], index: 3, kind: output, shape index: {}]  }
   0x1   :  { %v50_v0 = vld [vmem:[%s368_s1 + $0xf8] sm:$0xff]  ;;  %v49_v2 = vld [vmem:[%s368_s1 + $0xf0] sm:$0xff]  ;;  %v48_v4 = vld [vmem:[%s368_s1 + $0xe8] sm:$0xff] }
   0x2   :  { %v34_v1 = vld [vmem:[%s368_s1 + $0x78] sm:$0xff]  ;;  %171 = vmatprep.subr.mxu0 %v50_v0  ;;  %v33_v3 = vld [vmem:[%s368_s1 + $0x70] sm:$0xff]  ;;  %v32_v5 = vld [vmem:[%s368_s1 + $0x68] sm:$0xff] }
   0x3   :  { %172 = vmatpush3.msra.mxu0 %v34_v1  ;;  %v47_v6 = vld [vmem:[%s368_s1 + $0xe0] sm:$0xff]  ;;  %v46_v8 = vld [vmem:[%s368_s1 + $0xd8] sm:$0xff]  ;;  %v45_v10 = vld [vmem:[%s368_s1 + $0xd0] sm:$0xff] }
   0x4   :  { %173 = vmatprep.subr.mxu0 %v49_v2  ;;  %v31_v7 = vld [vmem:[%s368_s1 + $0x60] sm:$0xff]  ;;  %v30_v9 = vld [vmem:[%s368_s1 + $0x58] sm:$0xff]  ;;  %v29_v11 = vld [vmem:[%s368_s1 + $0x50] sm:$0xff] }
   0x5   :  { %174 = vmatpush3.msra.mxu0 %v33_v3  ;;  %v44_v12 = vld [vmem:[%s368_s1 + $0xc8] sm:$0xff]  ;;  %v43_v14 = vld [vmem:[%s368_s1 + $0xc0] sm:$0xff]  ;;  %v42_v18 = vld [vmem:[%s368_s1 + $0xb8] sm:$0xff] }
   0x6   :  { %175 = vmatprep.subr.mxu0 %v48_v4  ;;  %v28_v13 = vld [vmem:[%s368_s1 + $0x48] sm:$0xff]  ;;  %v212_v15 = vld.sshfl [vmem:[%s367_s0] sm:$0xff pattern:$0x76325410]  ;;  %v26_v19 = vld [vmem:[%s368_s1 + $0x38] sm:$0xff] }
   0x7   :  { %176 = vmatpush3.msra.mxu0 %v32_v5  ;;  %v213_v16 = vld.sshfl [vmem:[%s367_s0 + $0x8] sm:$0xff pattern:$0x76325410]  ;;  %v27_v17 = vld [vmem:[%s368_s1 + $0x40] sm:$0xff]  ;;  %v41_v20 = vld [vmem:[%s368_s1 + $0xb0] sm:$0xff] }
   0x8   :  { %177 = vmatprep.subr.mxu0 %v47_v6  ;;  %v79_v21 = vcombine.high %v212_v15, %v213_v16  ;;  %v25_v22 = vld [vmem:[%s368_s1 + $0x30] sm:$0xff]  ;;  %v40_v23 = vld [vmem:[%s368_s1 + $0xa8] sm:$0xff]  ;;  %v39_v25 = vld [vmem:[%s368_s1 + $0xa0] sm:$0xff]  ;;  %v78_v35 = vcombine.low %v212_v15, %v213_v16 }
   0x9   :  { %178 = vmatpush3.msra.mxu0 %v31_v7  ;;  %v24_v24 = vld [vmem:[%s368_s1 + $0x28] sm:$0xff]  ;;  %v23_v26 = vld [vmem:[%s368_s1 + $0x20] sm:$0xff]  ;;  %v38_v27 = vld [vmem:[%s368_s1 + $0x98] sm:$0xff] }
   0xa   :  { %179 = vmatprep.subr.mxu0 %v46_v8  ;;  %146 = vmatprep.mubr.f32.mxu0 %v79_v21  ;;  %v22_v28 = vld [vmem:[%s368_s1 + $0x18] sm:$0xff]  ;;  %v37_v29 = vld [vmem:[%s368_s1 + $0x90] sm:$0xff]  ;;  %v36_v31 = vld [vmem:[%s368_s1 + $0x88] sm:$0xff] }
   0xb   :  { %180 = vmatpush3.msra.mxu0 %v30_v9  ;;  %v21_v30 = vld [vmem:[%s368_s1 + $0x10] sm:$0xff]  ;;  %v20_v32 = vld [vmem:[%s368_s1 + $0x8] sm:$0xff]  ;;  %v35_v33 = vld [vmem:[%s368_s1 + $0x80] sm:$0xff] }
   0xc   :  { %181 = vmatprep.subr.mxu0 %v45_v10  ;;  %v19_v34 = vld [vmem:[%s368_s1] sm:$0xff] }
   0xd   :  { %182 = vmatpush3.msra.mxu0 %v29_v11  ;;  %v170_v37 = vld [vmem:[%s369_s2] ss:$0 sm:$0xff] }
   0xe   :  { %183 = vmatprep.subr.mxu0 %v44_v12 }
   0xf   :  { %184 = vmatpush3.msra.mxu0 %v28_v13 }
  0x10   :  { %185 = vmatprep.subr.mxu0 %v43_v14 }
  0x11   :  { %186 = vmatpush3.msra.mxu0 %v27_v17 }
  0x12   :  { %187 = vmatprep.subr.mxu0 %v42_v18 }
  0x13   :  { %188 = vmatpush3.msra.mxu0 %v26_v19 }
  0x14   :  { %189 = vmatprep.subr.mxu0 %v41_v20 }
  0x15   :  { %190 = vmatpush3.msra.mxu0 %v25_v22 }
  0x16   :  { %191 = vmatprep.subr.mxu0 %v40_v23 }
  0x17   :  { %192 = vmatpush3.msra.mxu0 %v24_v24 }
  0x18   :  { %193 = vmatprep.subr.mxu0 %v39_v25 }
  0x19   :  { %194 = vmatpush3.msra.mxu0 %v23_v26 }
  0x1a   :  { %195 = vmatprep.subr.mxu0 %v38_v27 }
  0x1b   :  { %196 = vmatpush3.msra.mxu0 %v22_v28 }
  0x1c   :  { %197 = vmatprep.subr.mxu0 %v37_v29 }
  0x1d   :  { %198 = vmatpush3.msra.mxu0 %v21_v30 }
  0x1e   :  { %199 = vmatprep.subr.mxu0 %v36_v31 }
  0x1f   :  { %200 = vmatpush3.msra.mxu0 %v20_v32 }
  0x20   :  { %201 = vmatprep.subr.mxu0 %v35_v33 }
  0x21   :  { %202 = vmatpush3.msra.mxu0 %v19_v34 }
  0x22   :  { %147 = vmatmul.mubr.f32.vlgmr.msra.gmra.mxu0 %v78_v35 }
  0xe2   :  { %v203_v36 = vpop.f32.mrf.mxu0 }
  0xe4   :  { %v204_v38 = vpop.f32.mrf.mxu0 }
  0xe5   :  { %v205_v39 = vadd.f32 %v204_v38, %v203_v36 }
  0xe7   :  { %v149_v40 = vadd.f32 %v205_v39, %v170_v37 }
  0xe9   :  { %153 = vst.msk [vmem:[#allocation2] sm:$0xff] %vm152_vm0, %v149_v40 }
  0xea   :  { %158 = vsyncadd [#allocation3], 96  ;;  %s236_s0 = smov [#allocation2]  }
  0xeb   :  { %s159_s27 = sshll.u32 %s236_s0, 4  ;;  %s160_s27 = int_to_ptr.vmem [resolvable:$true] %s159_s27 }
  0xec   :  { %s214_s1 = scalar_lea.vmem %s160_s27, 32  ;;  %s218_s28 = scalar_lea.vmem %s160_s27, 128 }
  0xed   :  { %p215_p0 = scmp.ne.s32.totalorder %s160_s27, %s214_s1  ;;  %p219_p1 = scmp.lt.s32.totalorder %s160_s27, %s160_s27 }
  0xee   :  { %p220_p2 = scmp.lt.s32.totalorder %s218_s28, %s214_s1 }
  0xf0   :  { %p221_p3 = por %p220_p2, %p219_p1 }
  0xf2   :  { %p222_p4 = pnand %p221_p3, %p215_p0 }
  0xf4   :  { %225 = shalt.err (!%p222_p4)
}
  0xf5   :  { %s237_s29 = smov 32   ;;  %s238_s30 = smov 2  }
  0xf6   :  { %165 = dma.vmem_to_hbm [thread:$0]  %s160_s27, 32, %s370_s3, [#allocation3], %s237_s29, %s237_s29, %s238_s30  }
  0xf7   :  { %234 = dma.done.wait [#allocation3], 128  }
  0xf8   :  { %235 = vsyncadd [#allocation3], 4294967168 }
  0xf9   :  { %169 = vsyncpa [#allocation3], 1 }

</bundles_post_ra>
